<compile_context>
chip_gen: v7x
topology: tpu7x:2x2x1
jax: 0.10.0
libtpu: 0.0.40
codegen_flags: <defaults>
</compile_context>

<pallas_src>
import functools

import jax
import jax.numpy as jnp
from jax.experimental import pallas as pl
from jax.experimental.pallas import tpu as pltpu

LANE = 128


def _make_mask_layer_kernel(cin: int, cout: int):
    """1x1 conv + bias + ReLU on a (1, cin, R, 128) tile -> (1, cout, R, 128)."""

    def kernel(w_ref, b_ref, x_ref, o_ref):
        # w_ref: (cout, cin) SMEM scalars, b_ref: (cout,) SMEM scalars.
        # x_ref: (1, cin, R, 128) VMEM tile, o_ref: (1, cout, R, 128) VMEM tile.
        for co in range(cout):                      # fully unrolled: cout*cin FMAs on VPU
            acc = x_ref[0, 0] * w_ref[co, 0]        # dense (R, 128) plane per channel
            for ci in range(1, cin):
                acc = acc + x_ref[0, ci] * w_ref[co, ci]
            acc = acc + b_ref[co]
            # Direct, lane-dense per-channel store (no concat temporary).
            o_ref[0, co] = jnp.maximum(acc, 0).astype(o_ref.dtype)

    return kernel


def _pick_tiling(hw: int, max_lanes: int):
    """Return (R, rows_padded): rows per tile and total padded row count.

    Rows are (.., 128)-lane slabs. R is either the full row extent (small
    inputs) or a multiple of 8 (f32 sublane tiling) that divides rows_padded.
    """
    rows_needed = -(-hw // LANE)
    max_rows = max(8, max_lanes // LANE)
    if rows_needed <= max_rows:
        # Single tile per batch along the spatial axis: full extent is always
        # a legal block dim.
        return rows_needed, rows_needed
    r = (max_rows // 8) * 8                      # tile rows: multiple of 8
    rows_padded = -(-rows_needed // r) * r       # pad rows up to a tile grid
    return r, rows_padded


@functools.partial(jax.jit, static_argnames=("max_hw_tile",))
def mask_layer_forward(x_nchw, weight, bias=None, *, max_hw_tile: int = 256 * 1024):
    """x_nchw: (N, Cin, H, W); weight: (Cout, Cin) (1x1 kernel squeezed);
    bias: (Cout,) or None. Returns ReLU(conv1x1(x)) with shape (N, Cout, H, W)."""
    N, Cin, H, W = x_nchw.shape
    Cout = weight.shape[0]
    HW = H * W

    weight = weight.astype(x_nchw.dtype)
    if bias is None:
        bias = jnp.zeros((Cout,), dtype=x_nchw.dtype)
    else:
        bias = bias.astype(x_nchw.dtype)

    R, rows_padded = _pick_tiling(HW, max_hw_tile)
    hw_padded = rows_padded * LANE

    # Free reshape (contiguous) + cheap zero-pad of the spatial axis only.
    x3 = x_nchw.reshape(N, Cin, HW)
    if hw_padded != HW:
        x3 = jnp.pad(x3, ((0, 0), (0, 0), (0, hw_padded - HW)))
    x4 = x3.reshape(N, Cin, rows_padded, LANE)

    grid = (N, rows_padded // R)

    itemsize = jnp.dtype(x_nchw.dtype).itemsize
    cost = pl.CostEstimate(
        flops=2 * N * hw_padded * Cin * Cout,
        transcendentals=0,
        bytes_accessed=N * hw_padded * (Cin + Cout) * itemsize,
    )

    out4 = pl.pallas_call(
        _make_mask_layer_kernel(Cin, Cout),
        out_shape=jax.ShapeDtypeStruct((N, Cout, rows_padded, LANE), x_nchw.dtype),
        grid_spec=pltpu.PrefetchScalarGridSpec(
            num_scalar_prefetch=0,
            grid=grid,
            in_specs=[
                # weight & bias: tiny, resident in SMEM, constant across the grid.
                pl.BlockSpec(memory_space=pltpu.MemorySpace.SMEM),
                pl.BlockSpec(memory_space=pltpu.MemorySpace.SMEM),
                # streaming input tile: channels as (R, 128) planes (dense vregs).
                pl.BlockSpec((1, Cin, R, LANE), lambda n, t: (n, 0, t, 0)),
            ],
            out_specs=pl.BlockSpec((1, Cout, R, LANE), lambda n, t: (n, 0, t, 0)),
        ),
        compiler_params=pltpu.CompilerParams(
            dimension_semantics=("parallel", "parallel"),
            vmem_limit_bytes=32 * 1024 * 1024,
        ),
        cost_estimate=cost,
    )(weight, bias, x4)

    out3 = out4.reshape(N, Cout, hw_padded)
    if hw_padded != HW:
        out3 = out3[:, :, :HW]
    return out3.reshape(N, Cout, H, W)


if __name__ == "__main__":
    # Module config: dim=4, use_bias=True -> conv1: Conv2d(4, 2, kernel_size=1)
    dim = 4
    out_dim = dim // 2
    N, H, W = 2, 16, 16

    key = jax.random.PRNGKey(0)
    kx, kw, kb = jax.random.split(key, 3)

    x = jax.random.normal(kx, (N, dim, H, W), dtype=jnp.float32)
    weight = jax.random.normal(kw, (out_dim, dim), dtype=jnp.float32) * 0.1
    bias = jax.random.normal(kb, (out_dim,), dtype=jnp.float32) * 0.1

    out = mask_layer_forward(x, weight, bias)
    out = jax.block_until_ready(out)

    # Plain-JAX reference of the same math.
    ref = jnp.maximum(
        jnp.einsum("nchw,oc->nohw", x, weight) + bias[None, :, None, None], 0.0
    )
    assert out.shape == (N, out_dim, H, W)
    assert jnp.allclose(out, ref, atol=1e-5, rtol=1e-5)

    print("KERNEL_OK")
</pallas_src>

<mosaic_0001>
module attributes {stable_mosaic.version = 11 : i64} {
  func.func @kernel(%arg0: i32, %arg1: i32, %arg2: memref<2x4xf32, #tpu.memory_space<smem>>, %arg3: memref<2xf32, #tpu.memory_space<smem>>, %arg4: memref<1x4x2x128xf32, #tpu.memory_space<vmem>>, %arg5: memref<1x2x2x128xf32, #tpu.memory_space<vmem>>) attributes {dimension_semantics = [#tpu.dimension_semantics<parallel>, #tpu.dimension_semantics<parallel>], iteration_bounds = array<i64: 2, 1>, scalar_prefetch = 0 : i64, scratch_operands = 0 : i64, tpu.core_type = #tpu.core_type<tc>, window_params = [{transform_indices = @transform_0, window_bounds = array<i64: 2, 4>}, {transform_indices = @transform_1, window_bounds = array<i64: 2>}, {transform_indices = @transform_2, window_bounds = array<i64: 1, 4, 2, 128>}, {transform_indices = @transform_3, window_bounds = array<i64: 1, 2, 2, 128>}]} {
    %c0 = arith.constant 0 : index
    %c0_0 = arith.constant 0 : index
    %c0_1 = arith.constant 0 : index
    %c0_2 = arith.constant 0 : index
    %0 = vector.load %arg4[%c0, %c0_0, %c0_1, %c0_2] : memref<1x4x2x128xf32, #tpu.memory_space<vmem>>, vector<1x1x2x128xf32>
    %1 = vector.shape_cast %0 : vector<1x1x2x128xf32> to vector<2x128xf32>
    %c0_3 = arith.constant 0 : index
    %c0_4 = arith.constant 0 : index
    %2 = memref.load %arg2[%c0_3, %c0_4] : memref<2x4xf32, #tpu.memory_space<smem>>
    %3 = vector.broadcast %2 : f32 to vector<2x128xf32>
    %4 = arith.mulf %1, %3 : vector<2x128xf32>
    %c0_5 = arith.constant 0 : index
    %c1 = arith.constant 1 : index
    %c0_6 = arith.constant 0 : index
    %c0_7 = arith.constant 0 : index
    %5 = vector.load %arg4[%c0_5, %c1, %c0_6, %c0_7] : memref<1x4x2x128xf32, #tpu.memory_space<vmem>>, vector<1x1x2x128xf32>
    %6 = vector.shape_cast %5 : vector<1x1x2x128xf32> to vector<2x128xf32>
    %c0_8 = arith.constant 0 : index
    %c1_9 = arith.constant 1 : index
    %7 = memref.load %arg2[%c0_8, %c1_9] : memref<2x4xf32, #tpu.memory_space<smem>>
    %8 = vector.broadcast %7 : f32 to vector<2x128xf32>
    %9 = arith.mulf %6, %8 : vector<2x128xf32>
    %10 = arith.addf %4, %9 : vector<2x128xf32>
    %c0_10 = arith.constant 0 : index
    %c2 = arith.constant 2 : index
    %c0_11 = arith.constant 0 : index
    %c0_12 = arith.constant 0 : index
    %11 = vector.load %arg4[%c0_10, %c2, %c0_11, %c0_12] : memref<1x4x2x128xf32, #tpu.memory_space<vmem>>, vector<1x1x2x128xf32>
    %12 = vector.shape_cast %11 : vector<1x1x2x128xf32> to vector<2x128xf32>
    %c0_13 = arith.constant 0 : index
    %c2_14 = arith.constant 2 : index
    %13 = memref.load %arg2[%c0_13, %c2_14] : memref<2x4xf32, #tpu.memory_space<smem>>
    %14 = vector.broadcast %13 : f32 to vector<2x128xf32>
    %15 = arith.mulf %12, %14 : vector<2x128xf32>
    %16 = arith.addf %10, %15 : vector<2x128xf32>
    %c0_15 = arith.constant 0 : index
    %c3 = arith.constant 3 : index
    %c0_16 = arith.constant 0 : index
    %c0_17 = arith.constant 0 : index
    %17 = vector.load %arg4[%c0_15, %c3, %c0_16, %c0_17] : memref<1x4x2x128xf32, #tpu.memory_space<vmem>>, vector<1x1x2x128xf32>
    %18 = vector.shape_cast %17 : vector<1x1x2x128xf32> to vector<2x128xf32>
    %c0_18 = arith.constant 0 : index
    %c3_19 = arith.constant 3 : index
    %19 = memref.load %arg2[%c0_18, %c3_19] : memref<2x4xf32, #tpu.memory_space<smem>>
    %20 = vector.broadcast %19 : f32 to vector<2x128xf32>
    %21 = arith.mulf %18, %20 : vector<2x128xf32>
    %22 = arith.addf %16, %21 : vector<2x128xf32>
    %c0_20 = arith.constant 0 : index
    %23 = memref.load %arg3[%c0_20] : memref<2xf32, #tpu.memory_space<smem>>
    %24 = vector.broadcast %23 : f32 to vector<2x128xf32>
    %25 = arith.addf %22, %24 : vector<2x128xf32>
    %cst = arith.constant 0.000000e+00 : f32
    %26 = vector.broadcast %cst : f32 to vector<2x128xf32>
    %27 = arith.maximumf %25, %26 : vector<2x128xf32>
    %c0_21 = arith.constant 0 : index
    %c0_22 = arith.constant 0 : index
    %c0_23 = arith.constant 0 : index
    %c0_24 = arith.constant 0 : index
    %28 = vector.load %arg5[%c0_21, %c0_22, %c0_23, %c0_24] : memref<1x2x2x128xf32, #tpu.memory_space<vmem>>, vector<1x1x2x128xf32>
    %29 = vector.shape_cast %28 : vector<1x1x2x128xf32> to vector<2x128xf32>
    %30 = vector.shape_cast %27 : vector<2x128xf32> to vector<1x1x2x128xf32>
    tpu.vector_store %arg5[%c0_21, %c0_22, %c0_23, %c0_24], %30 {strides = array<i32>} : memref<1x2x2x128xf32, #tpu.memory_space<vmem>>, vector<1x1x2x128xf32>,
    %c0_25 = arith.constant 0 : index
    %c0_26 = arith.constant 0 : index
    %c0_27 = arith.constant 0 : index
    %c0_28 = arith.constant 0 : index
    %31 = vector.load %arg4[%c0_25, %c0_26, %c0_27, %c0_28] : memref<1x4x2x128xf32, #tpu.memory_space<vmem>>, vector<1x1x2x128xf32>
    %32 = vector.shape_cast %31 : vector<1x1x2x128xf32> to vector<2x128xf32>
    %c1_29 = arith.constant 1 : index
    %c0_30 = arith.constant 0 : index
    %33 = memref.load %arg2[%c1_29, %c0_30] : memref<2x4xf32, #tpu.memory_space<smem>>
    %34 = vector.broadcast %33 : f32 to vector<2x128xf32>
    %35 = arith.mulf %32, %34 : vector<2x128xf32>
    %c0_31 = arith.constant 0 : index
    %c1_32 = arith.constant 1 : index
    %c0_33 = arith.constant 0 : index
    %c0_34 = arith.constant 0 : index
    %36 = vector.load %arg4[%c0_31, %c1_32, %c0_33, %c0_34] : memref<1x4x2x128xf32, #tpu.memory_space<vmem>>, vector<1x1x2x128xf32>
    %37 = vector.shape_cast %36 : vector<1x1x2x128xf32> to vector<2x128xf32>
    %c1_35 = arith.constant 1 : index
    %c1_36 = arith.constant 1 : index
    %38 = memref.load %arg2[%c1_35, %c1_36] : memref<2x4xf32, #tpu.memory_space<smem>>
    %39 = vector.broadcast %38 : f32 to vector<2x128xf32>
    %40 = arith.mulf %37, %39 : vector<2x128xf32>
    %41 = arith.addf %35, %40 : vector<2x128xf32>
    %c0_37 = arith.constant 0 : index
    %c2_38 = arith.constant 2 : index
    %c0_39 = arith.constant 0 : index
    %c0_40 = arith.constant 0 : index
    %42 = vector.load %arg4[%c0_37, %c2_38, %c0_39, %c0_40] : memref<1x4x2x128xf32, #tpu.memory_space<vmem>>, vector<1x1x2x128xf32>
    %43 = vector.shape_cast %42 : vector<1x1x2x128xf32> to vector<2x128xf32>
    %c1_41 = arith.constant 1 : index
    %c2_42 = arith.constant 2 : index
    %44 = memref.load %arg2[%c1_41, %c2_42] : memref<2x4xf32, #tpu.memory_space<smem>>
    %45 = vector.broadcast %44 : f32 to vector<2x128xf32>
    %46 = arith.mulf %43, %45 : vector<2x128xf32>
    %47 = arith.addf %41, %46 : vector<2x128xf32>
    %c0_43 = arith.constant 0 : index
    %c3_44 = arith.constant 3 : index
    %c0_45 = arith.constant 0 : index
    %c0_46 = arith.constant 0 : index
    %48 = vector.load %arg4[%c0_43, %c3_44, %c0_45, %c0_46] : memref<1x4x2x128xf32, #tpu.memory_space<vmem>>, vector<1x1x2x128xf32>
    %49 = vector.shape_cast %48 : vector<1x1x2x128xf32> to vector<2x128xf32>
    %c1_47 = arith.constant 1 : index
    %c3_48 = arith.constant 3 : index
    %50 = memref.load %arg2[%c1_47, %c3_48] : memref<2x4xf32, #tpu.memory_space<smem>>
    %51 = vector.broadcast %50 : f32 to vector<2x128xf32>
    %52 = arith.mulf %49, %51 : vector<2x128xf32>
    %53 = arith.addf %47, %52 : vector<2x128xf32>
    %c1_49 = arith.constant 1 : index
    %54 = memref.load %arg3[%c1_49] : memref<2xf32, #tpu.memory_space<smem>>
    %55 = vector.broadcast %54 : f32 to vector<2x128xf32>
    %56 = arith.addf %53, %55 : vector<2x128xf32>
    %cst_50 = arith.constant 0.000000e+00 : f32
    %57 = vector.broadcast %cst_50 : f32 to vector<2x128xf32>
    %58 = arith.maximumf %56, %57 : vector<2x128xf32>
    %c0_51 = arith.constant 0 : index
    %c1_52 = arith.constant 1 : index
    %c0_53 = arith.constant 0 : index
    %c0_54 = arith.constant 0 : index
    %59 = vector.load %arg5[%c0_51, %c1_52, %c0_53, %c0_54] : memref<1x2x2x128xf32, #tpu.memory_space<vmem>>, vector<1x1x2x128xf32>
    %60 = vector.shape_cast %59 : vector<1x1x2x128xf32> to vector<2x128xf32>
    %61 = vector.shape_cast %58 : vector<2x128xf32> to vector<1x1x2x128xf32>
    tpu.vector_store %arg5[%c0_51, %c1_52, %c0_53, %c0_54], %61 {strides = array<i32>} : memref<1x2x2x128xf32, #tpu.memory_space<vmem>>, vector<1x1x2x128xf32>,
    return
  }
  func.func @transform_0(%arg0: i32, %arg1: i32) -> (i32, i32) {
    %c0_i32 = arith.constant 0 : i32
    %c0_i32_0 = arith.constant 0 : i32
    %c0_i32_1 = arith.constant 0 : i32
    return %c0_i32, %c0_i32_0 : i32, i32
  }
  func.func @transform_1(%arg0: i32, %arg1: i32) -> i32 {
    %c0_i32 = arith.constant 0 : i32
    %c0_i32_0 = arith.constant 0 : i32
    return %c0_i32 : i32
  }
  func.func @transform_2(%arg0: i32, %arg1: i32) -> (i32, i32, i32, i32) {
    %c0_i32 = arith.constant 0 : i32
    %c0_i32_0 = arith.constant 0 : i32
    %c0_i32_1 = arith.constant 0 : i32
    return %arg0, %c0_i32, %arg1, %c0_i32_0 : i32, i32, i32, i32
  }
  func.func @transform_3(%arg0: i32, %arg1: i32) -> (i32, i32, i32, i32) {
    %c0_i32 = arith.constant 0 : i32
    %c0_i32_0 = arith.constant 0 : i32
    %c0_i32_1 = arith.constant 0 : i32
    return %arg0, %c0_i32, %arg1, %c0_i32_0 : i32, i32, i32, i32
  }
}

</mosaic_0001>

<bundles_post_ra>
// kernel: mask_layer_forward.1
= control target key start
LH: loop header
LB: loop body
LE: loop exit
PB: predicated region body
PF: predicated region fallthrough
CT: control target
= control target key end

     0   :  { %8 = vsyncpa [#allocation3], 0  ;;  %s641_s0 = inlined_call_operand.vmem [shape: f32[2,4], index: 0, kind: input, shape index: {}]   ;;  %s642_s1 = inlined_call_operand.vmem [shape: f32[2], index: 1, kind: input, shape index: {}]   ;;  %s643_s2 = inlined_call_operand.vmem [shape: f32[2,4,2,128], index: 2, kind: input, shape index: {}]   ;;  %s644_s3 = inlined_call_operand.vmem [shape: f32[2,2,2,128], index: 3, kind: output, shape index: {}]  }
   0x1   :  { %9 = vsyncpa [#allocation5], 0  ;;  %s548_s12 = smov 0   ;;  %s550_s13 = smov 0  }
   0x2   :  { %s552_s14 = smov 0  }
   0x3 LB: > { %s387_s15 = sadd.s32 4294967295, %s524_s14   ;;  %s27_s16 = sadd.s32 1, %s520_s13  ;;  %s524_s14 = sphi %s552_s14, %s15_s14   ;;  %s520_s13 = sphi %s550_s13, %s654_s13   ;;  %s516_s12 = sphi %s548_s12, %s653_s12  }
   0x4   : > { %p29_p0 = scmp.ge.s32.totalorder %s27_s16, 2  ;;  %p389_p1 = scmp.ge.s32.totalorder %s524_s14, 1 }
   0x5   : > { %p130_p2 = scmp.lt.s32.totalorder %s524_s14, 3  ;;  %p573_p4 = scmp.eq.s32.totalorder %s387_s15, 0 }
   0x6   : > { %s656_s16 = smov (%p29_p0, %s27_s16), 0  ;;  %s143_s21 = sshll.u32 %s641_s0, 4  ;;  %s144_s21 = int_to_ptr.vmem [resolvable:$true] %s143_s21 }
   0x7   : > { %p569_p3 = pnand %p389_p1, %p130_p2  ;;  %s154_s24 = sshll.u32 %s642_s1, 4  ;;  %s155_s24 = int_to_ptr.vmem [resolvable:$true] %s154_s24 }
   0x8   : > { %s649_s18 = scalar_select %p573_p4, 1, 0 }
   0x9   : > { %s648_s17 = scalar_select %p569_p3, 1, 0 }
   0xa   : > { %p427_p5 = pneg %p569_p3  ;;  %s464_s26 = scalar_lea.vmem %s144_s21, 32 }
   0xb   : > { %p465_p7 = scmp.ne.s32.totalorder %s144_s21, %s464_s26  ;;  %p472_p11 = scmp.lt.s32.totalorder %s144_s21, %s144_s21 }
   0xc   : > { %p587_p6 = pnand %p573_p4, %p427_p5  ;;  %p473_p12 = scmp.lt.s32.totalorder %s464_s26, %s464_s26 }
   0xe   : > { %p466_p8 = pneg %p587_p6  ;;  %p474_p13 = por %p473_p12, %p472_p11 }
  0x10   : > { %p467_p9 = pnand %p466_p8, %p465_p7 }
  0x12   : > { %p468_p10 = pneg %p467_p9 }
  0x14   : > { %p475_p0 = pnand %p474_p13, %p468_p10 }
  0x16   : > { %478 = shalt.err (!%p475_p0)
}
  0x17   : > { %s526_s27 = smov [#allocation2]   ;;  %s479_s28 = scalar_lea.vmem %s155_s24, 16 }
  0x18   : > { %430 = dma.vmem_to_smem (!%p587_p6), %s144_s21, 32, %s526_s27, [#allocation3]  }
  0x19   : > { %p480_p1 = scmp.ne.s32.totalorder %s155_s24, %s479_s28  ;;  %p487_p4 = scmp.lt.s32.totalorder %s155_s24, %s155_s24 }
  0x1a   : > { %p488_p3 = scmp.lt.s32.totalorder %s479_s28, %s479_s28 }
  0x1b   : > { %p482_p2 = pnand %p480_p1, %p466_p8 }
  0x1c   : > { %p489_p7 = por %p488_p3, %p487_p4 }
  0x1d   : > { %p483_p5 = pneg %p482_p2 }
  0x1f   : > { %p490_p9 = pnand %p489_p7, %p483_p5 }
  0x21   : > { %493 = shalt.err (!%p490_p9)
}
  0x22   : > { %s527_s29 = smov [#allocation4]   ;;  %p651_p10 = scmp.ne.s32.totalorder %s648_s17, 0 }
  0x23   : > { %433 = dma.vmem_to_smem (!%p587_p6), %s155_s24, 16, %s527_s29, [#allocation5]  }
  0x24   : > { %178 = sbr.rel (%p651_p10) target bundleno = 74 (0x4a), region = 32  ;;  %p652_p11 = scmp.ne.s32.totalorder (!%p651_p10), %s649_s18, 0 }
  0x2b   : > { %507 = dma.done.wait (%p652_p11), [#allocation3], 32  }
  0x2c   : > { %509 = vsyncadd (%p652_p11), [#allocation3], 4294967264 }
  0x2d   : > { %511 = dma.done.wait (%p652_p11), [#allocation5], 16  }
  0x2e   : > { %513 = vsyncadd (%p652_p11), [#allocation5], 4294967280 }
  0x2f   : > { %188 = sfence }
  0x30   : > { %p213_p3 = scmp.lt.s32.totalorder %s516_s12, 1  ;;  %s230_s30 = sld [smem:[#allocation2]] }
  0x31   : > { %s401_s4 = sld [smem:[#allocation2 + $0x1]]  ;;  %s403_s5 = sld [smem:[#allocation2 + $0x2]] }
  0x32   : > { %s658_s12 = smov (!%p213_p3, %s516_s12), 1  ;;  %s405_s6 = sld [smem:[#allocation2 + $0x3]] }
  0x33   : > { %s417_s7 = sshll.u32 %s658_s12, 3  ;;  %s617_s11 = sld [smem:[#allocation4]] }
  0x34   : > { %s615_s10 = scalar_lea.vmem %s643_s2, %s417_s7  ;;  %s406_s15 = sld [smem:[#allocation2 + $0x80]] }
  0x35   : > { %v229_v0 = vld [vmem:[%s615_s10] sm:$0x3]  ;;  %v400_v2 = vld [vmem:[%s615_s10 + $0x2] sm:$0x3]  ;;  %v402_v3 = vld [vmem:[%s615_s10 + $0x4] sm:$0x3] }
  0x36   : > { %v231_v1 = vstv %s230_s30  ;;  %v404_v7 = vld [vmem:[%s615_s10 + $0x6] sm:$0x3]  ;;  %s408_s17 = sld [smem:[#allocation2 + $0x81]]  ;;  %s410_s18 = sld [smem:[#allocation2 + $0x82]]  ;;  %v256_v13 = vld [vmem:[%s615_s10] sm:$0x3] }
  0x37   : > { %v232_v4 = vmul.f32 %v231_v1, %v229_v0  ;;  %v236_v5 = vstv %s401_s4  ;;  %v242_v6 = vstv %s403_s5  ;;  %s412_s19 = sld [smem:[#allocation2 + $0x83]]  ;;  %v407_v15 = vld [vmem:[%s615_s10 + $0x2] sm:$0x3]  ;;  %s413_s20 = sld [smem:[#allocation4 + $0x1]]  ;;  %v409_v18 = vld [vmem:[%s615_s10 + $0x4] sm:$0x3] }
  0x38   : > { %v237_v8 = vmul.f32 %v400_v2, %v236_v5  ;;  %v243_v9 = vmul.f32 %v402_v3, %v242_v6  ;;  %v248_v10 = vstv %s405_s6  ;;  %s418_s21 = sshll.u32 %s658_s12, 2  ;;  %v411_v22 = vld [vmem:[%s615_s10 + $0x6] sm:$0x3] }
  0x39   : > { %v249_v12 = vmul.f32 %v404_v7, %v248_v10  ;;  %v252_v16 = vstv %s617_s11  ;;  %s228_s24 = scalar_lea.vmem %s644_s3, %s418_s21 }
  0x3a   : > { %v238_v11 = vadd.f32 %v237_v8, %v232_v4  ;;  %v258_v17 = vstv %s406_s15 }
  0x3b   : > { %v259_v20 = vmul.f32 %v258_v17, %v256_v13 }
  0x3c   : > { %v244_v14 = vadd.f32 %v243_v9, %v238_v11  ;;  %v262_v21 = vstv %s408_s17  ;;  %v267_v24 = vstv %s410_s18 }
  0x3d   : > { %v263_v23 = vmul.f32 %v407_v15, %v262_v21  ;;  %v272_v25 = vstv %s412_s19  ;;  %v268_v27 = vmul.f32 %v409_v18, %v267_v24  ;;  %v276_v32 = vstv %s413_s20 }
  0x3e   : > { %v250_v19 = vadd.f32 %v249_v12, %v244_v14  ;;  %v273_v29 = vmul.f32 %v411_v22, %v272_v25 }
  0x3f   : > { %v264_v28 = vadd.f32 %v263_v23, %v259_v20 }
  0x40   : > { %v253_v26 = vadd.f32 %v252_v16, %v250_v19 }
  0x41   : > { %v269_v31 = vadd.f32 %v268_v27, %v264_v28 }
  0x42   : > { %v254_v30 = vmax.f32 %v253_v26, 0.0 }
  0x43   : > { %v274_v33 = vadd.f32 %v273_v29, %v269_v31 }
  0x44   : > { %255 = vst [vmem:[%s228_s24] sm:$0x3] %v254_v30 }
  0x45   : > { %v277_v34 = vadd.f32 %v276_v32, %v274_v33 }
  0x47   : > { %v278_v35 = vmax.f32 %v277_v34, 0.0 }
  0x49   : > { %414 = vst [vmem:[%s228_s24 + $0x2] sm:$0x3] %v278_v35 }
  0x4a PF: > { %s15_s14 = sadd.s32 1, %s524_s14   ;;  %s653_s12 = smov %s520_s13 }
  0x4b   : > { %p12_p4 = scmp.ge.s32.totalorder %s15_s14, 4   ;;  %s654_s13 = smov %s656_s16 }
  0x4d   :  { %14 = sbr.rel (!%p12_p4) target bundleno = 3 (0x3), region = 75 }
  0x54   :  { %308 = vsyncpa [#allocation3], 1 }
  0x55   :  { %310 = vsyncpa [#allocation3 + $0x1], 1 }
  0x56   :  { %311 = vsyncpa [#allocation5], 1 }

</bundles_post_ra>
